<compile_context>
chip_gen: v5e
topology: v5e:2x2
jax: 0.10.0
libtpu: 0.0.40
codegen_flags: <defaults>
</compile_context>

<pallas_src>
import functools

import jax
import jax.numpy as jnp
from jax import lax
from jax.experimental import pallas as pl
from jax.experimental.pallas import tpu as pltpu


_MASK_VALUE = -1e30  # finite "minus infinity" for padded-key masking


def _round_up(a, b):
    return (a + b - 1) // b * b


def prepare_qkv_weight(w_query, w_key, w_value, *, dtype=jnp.bfloat16):
    """Fuse W_q|W_k|W_v into one lane-padded (d_in, 3*d_out_p) operand.

    The 1/sqrt(d_out) attention scale is folded into the query columns, so the
    kernel never applies it.  Call once per weight update (hoisted out of the
    per-forward HBM path).
    """
    d_in, d_out = w_query.shape
    d_out_p = _round_up(d_out, 128)          # lane-dense head dim
    scale = 1.0 / (float(d_out) ** 0.5)      # true d_out, not the padded one

    def _pad(w):
        return jnp.pad(w, ((0, 0), (0, d_out_p - d_out)))

    w_qkv = jnp.concatenate(
        [_pad(w_query * scale), _pad(w_key), _pad(w_value)], axis=1)
    return w_qkv.astype(dtype), d_out, d_out_p


def _flash_attn_kernel(xq_ref, xkv_ref, w_ref, o_ref,
                       q_scr, m_scr, l_scr, acc_scr,
                       *, d_out_p, seq_len, block_kv, mask_keys):
    ki = pl.program_id(1)

    @pl.when(ki == 0)
    def _init():
        # Q projection for this query tile; scale already folded into w_q.
        # bf16 cast happens after the VMEM load (no wrapper-side cast pass).
        xq = xq_ref[...].astype(jnp.bfloat16)
        q = jnp.dot(xq, w_ref[:, 0:d_out_p],
                    preferred_element_type=jnp.float32)
        q_scr[...] = q.astype(jnp.bfloat16)
        m_scr[...] = jnp.full(m_scr.shape, -jnp.inf, dtype=m_scr.dtype)
        l_scr[...] = jnp.zeros(l_scr.shape, dtype=l_scr.dtype)
        acc_scr[...] = jnp.zeros(acc_scr.shape, dtype=acc_scr.dtype)

    # K/V projection for this KV tile: one fused MXU matmul against the
    # key+value halves of the weight; cast to bf16 right away so only bf16
    # K/V stay live through the softmax update.
    xkv = xkv_ref[...].astype(jnp.bfloat16)
    kv = jnp.dot(xkv, w_ref[:, d_out_p:3 * d_out_p],
                 preferred_element_type=jnp.float32)        # (Tk, 2*d_out_p)
    k = kv[:, 0:d_out_p].astype(jnp.bfloat16)
    v = kv[:, d_out_p:2 * d_out_p].astype(jnp.bfloat16)

    # scores = q @ k^T: contract last dims directly (no materialized K^T).
    s = lax.dot_general(
        q_scr[...], k,
        dimension_numbers=(((1,), (1,)), ((), ())),
        preferred_element_type=jnp.float32)                  # (Tq, Tk) f32

    if mask_keys:
        key_idx = ki * block_kv + lax.broadcasted_iota(jnp.int32, s.shape, 1)
        s = jnp.where(key_idx < seq_len, s, _MASK_VALUE)

    # Online softmax; all running statistics stay in f32 across KV tiles.
    m_prev = m_scr[...]
    m_new = jnp.maximum(m_prev, jnp.max(s, axis=-1, keepdims=True))
    alpha = jnp.exp(m_prev - m_new)
    p = jnp.exp(s - m_new)
    l_scr[...] = alpha * l_scr[...] + jnp.sum(p, axis=-1, keepdims=True)
    acc_scr[...] = alpha * acc_scr[...] + jnp.dot(
        p.astype(jnp.bfloat16), v, preferred_element_type=jnp.float32)
    m_scr[...] = m_new

    @pl.when(ki == pl.num_programs(1) - 1)
    def _finalize():
        # Exact divide on a (Tq, 1) denominator: essentially free and tighter
        # than the approximate EUP reciprocal.
        o_ref[...] = (acc_scr[...] / l_scr[...]).astype(o_ref.dtype)


def _flash_self_attention(x, w_qkv, d_out_p, *, block_q=256, block_kv=256):
    """x: (S, d_in) any float dtype; w_qkv: (d_in, 3*d_out_p) bf16.

    Returns (S_q_pad, d_out_p) f32 (caller slices padding off).
    """
    S, d_in = x.shape

    # Tile sizes: 256-aligned targets (good for v6e/v7x 256-wide MXU, also a
    # multiple of 128 for v5e); clamp to the (sublane-rounded) sequence length
    # for small inputs.
    s8 = _round_up(S, 8)
    t_q = min(block_q, s8)
    t_kv = min(block_kv, s8)
    sq_pad = _round_up(S, t_q)
    sk_pad = _round_up(S, t_kv)

    x_q = jnp.pad(x, ((0, sq_pad - S), (0, 0))) if sq_pad != S else x
    x_kv = jnp.pad(x, ((0, sk_pad - S), (0, 0))) if sk_pad != S else x

    grid = (sq_pad // t_q, sk_pad // t_kv)
    mask_keys = sk_pad != S   # padded key rows must not receive softmax mass

    kernel = functools.partial(
        _flash_attn_kernel,
        d_out_p=d_out_p, seq_len=S, block_kv=t_kv, mask_keys=mask_keys)

    # VMEM budget: double-buffered input/output tiles + resident weight +
    # scratch + headroom for the (Tq, Tk) f32 softmax temporaries.
    x_itemsize = x.dtype.itemsize
    w_bytes = w_qkv.size * w_qkv.dtype.itemsize
    vmem_est = (
        2 * (t_q * d_in * x_itemsize)
        + 2 * (t_kv * d_in * x_itemsize)
        + 2 * w_bytes
        + 2 * (t_q * d_out_p * 4)
        + t_q * d_out_p * 2          # q scratch (bf16)
        + 2 * (t_q * 4)              # m, l
        + t_q * d_out_p * 4          # accumulator
        + 6 * t_q * t_kv * 4)        # score/exp temporaries headroom
    vmem_limit = int(min(64 << 20, max(32 << 20, 2 * vmem_est)))

    cost = pl.CostEstimate(
        flops=int(2 * S * d_in * 3 * d_out_p + 4 * S * S * d_out_p),
        transcendentals=int(S * S),
        bytes_accessed=int(2 * x.size * x_itemsize + w_bytes
                           + sq_pad * d_out_p * 4),
    )

    return pl.pallas_call(
        kernel,
        out_shape=jax.ShapeDtypeStruct((sq_pad, d_out_p), jnp.float32),
        grid_spec=pltpu.PrefetchScalarGridSpec(
            num_scalar_prefetch=0,
            grid=grid,
            in_specs=[
                pl.BlockSpec((t_q, d_in), lambda qi, ki: (qi, 0)),
                pl.BlockSpec((t_kv, d_in), lambda qi, ki: (ki, 0)),
                pl.BlockSpec((d_in, w_qkv.shape[1]), lambda qi, ki: (0, 0)),
            ],
            out_specs=pl.BlockSpec((t_q, d_out_p), lambda qi, ki: (qi, 0)),
            scratch_shapes=[
                pltpu.VMEM((t_q, d_out_p), jnp.bfloat16),   # q tile (scaled)
                pltpu.VMEM((t_q, 1), jnp.float32),          # running max m
                pltpu.VMEM((t_q, 1), jnp.float32),          # running sum l
                pltpu.VMEM((t_q, d_out_p), jnp.float32),    # output accumulator
            ],
        ),
        compiler_params=pltpu.CompilerParams(
            dimension_semantics=("parallel", "arbitrary"),
            vmem_limit_bytes=vmem_limit,
        ),
        cost_estimate=cost,
    )(x_q, x_kv, w_qkv)


def self_attention_v2(x, w_query, w_key, w_value, *, block_q=256, block_kv=256):
    """x: (S, d_in); w_*: (d_in, d_out) = nn.Linear(d_in, d_out).weight.T.

    Returns (S, d_out) f32, matching SelfAttention_v2.forward.
    """
    S, _ = x.shape
    # TODO(synk): in a real model, call prepare_qkv_weight once per weight
    # update and keep the padded layout downstream; it is inlined here only so
    # the demo stays self-contained.
    w_qkv, d_out, d_out_p = prepare_qkv_weight(w_query, w_key, w_value)
    out = _flash_self_attention(x, w_qkv, d_out_p,
                                block_q=block_q, block_kv=block_kv)
    return out[:S, :d_out]


def self_attention_v2_ref(x, w_query, w_key, w_value):
    """Pure-JAX f32 reference mirroring the PyTorch forward."""
    q = x @ w_query
    k = x @ w_key
    v = x @ w_value
    scores = q @ k.T
    weights = jax.nn.softmax(scores / jnp.sqrt(jnp.float32(k.shape[-1])), axis=-1)
    return weights @ v


if __name__ == "__main__":
    key = jax.random.PRNGKey(0)
    kx, kq, kk, kv, kx2 = jax.random.split(key, 5)

    # Small shapes consistent with the module: seq=8 tokens, d_in=32, d_out=16.
    S, d_in, d_out = 8, 32, 16
    x = jax.random.normal(kx, (S, d_in), dtype=jnp.float32)
    w_query = jax.random.normal(kq, (d_in, d_out), dtype=jnp.float32) * 0.1
    w_key = jax.random.normal(kk, (d_in, d_out), dtype=jnp.float32) * 0.1
    w_value = jax.random.normal(kv, (d_in, d_out), dtype=jnp.float32) * 0.1

    out = jax.block_until_ready(self_attention_v2(x, w_query, w_key, w_value))
    ref = self_attention_v2_ref(x, w_query, w_key, w_value)
    assert out.shape == (S, d_out)
    # bf16 matmul operands (standard attention practice); softmax in f32 with
    # an exact final divide.
    assert jnp.allclose(out, ref, atol=3e-2, rtol=2e-2), (
        float(jnp.max(jnp.abs(out - ref))))

    # Second check: exercise the multi-tile grid + padded-key masking path
    # (S=12 with 8x8 tiles -> 2x2 grid, online softmax across KV tiles).
    S2 = 12
    x2 = jax.random.normal(kx2, (S2, d_in), dtype=jnp.float32)
    out2 = jax.block_until_ready(
        self_attention_v2(x2, w_query, w_key, w_value, block_q=8, block_kv=8))
    ref2 = self_attention_v2_ref(x2, w_query, w_key, w_value)
    assert out2.shape == (S2, d_out)
    assert jnp.allclose(out2, ref2, atol=3e-2, rtol=2e-2), (
        float(jnp.max(jnp.abs(out2 - ref2))))

    print("KERNEL_OK")
</pallas_src>

<mosaic_0001>
module attributes {stable_mosaic.version = 11 : i64} {
  func.func @_flash_attn_kernel(%arg0: i32, %arg1: i32, %arg2: memref<8x32xf32, #tpu.memory_space<vmem>>, %arg3: memref<8x32xf32, #tpu.memory_space<vmem>>, %arg4: memref<32x384xbf16, #tpu.memory_space<vmem>>, %arg5: memref<8x128xf32, #tpu.memory_space<vmem>>, %arg6: memref<8x128xbf16, #tpu.memory_space<vmem>>, %arg7: memref<8x1xf32, #tpu.memory_space<vmem>>, %arg8: memref<8x1xf32, #tpu.memory_space<vmem>>, %arg9: memref<8x128xf32, #tpu.memory_space<vmem>>) attributes {dimension_semantics = [#tpu.dimension_semantics<parallel>, #tpu.dimension_semantics<arbitrary>], iteration_bounds = array<i64: 1, 1>, scalar_prefetch = 0 : i64, scratch_operands = 4 : i64, tpu.core_type = #tpu.core_type<tc>, window_params = [{transform_indices = @transform_0, window_bounds = array<i64: 8, 32>}, {transform_indices = @transform_1, window_bounds = array<i64: 8, 32>}, {pipeline_mode = #tpu.pipeline_mode<synchronous>, transform_indices = @transform_2, window_bounds = array<i64: 32, 384>}, {transform_indices = @transform_3, window_bounds = array<i64: 8, 128>}]} {
    %c0_i32 = arith.constant 0 : i32
    %0 = arith.cmpi eq, %arg1, %c0_i32 : i32
    %1 = arith.extui %0 : i1 to i32
    %c0_i32_0 = arith.constant 0 : i32
    %2 = arith.cmpi ne, %1, %c0_i32_0 : i32
    scf.if %2 {
      %c0_23 = arith.constant 0 : index
      %c0_24 = arith.constant 0 : index
      %39 = vector.load %arg2[%c0_23, %c0_24] : memref<8x32xf32, #tpu.memory_space<vmem>>, vector<8x32xf32>
      %40 = arith.truncf %39 : vector<8x32xf32> to vector<8x32xbf16>
      %c0_25 = arith.constant 0 : index
      %c0_26 = arith.constant 0 : index
      %41 = vector.load %arg4[%c0_25, %c0_26] : memref<32x384xbf16, #tpu.memory_space<vmem>>, vector<32x128xbf16>
      %cst_27 = arith.constant dense<0.000000e+00> : vector<8x128xf32>
      %42 = tpu.matmul %40, %41, %cst_27 {dimension_numbers = #tpu.dot_dimension_numbers<[1], [0], [0], [1], [0, 0, 1, 1], [], []>} : vector<8x32xbf16>, vector<32x128xbf16>, vector<8x128xf32> -> vector<8x128xf32>
      %43 = arith.truncf %42 : vector<8x128xf32> to vector<8x128xbf16>
      %c0_28 = arith.constant 0 : index
      %c0_29 = arith.constant 0 : index
      %44 = vector.load %arg6[%c0_28, %c0_29] : memref<8x128xbf16, #tpu.memory_space<vmem>>, vector<8x128xbf16>
      tpu.vector_store %arg6[%c0_28, %c0_29], %43 {strides = array<i32>} : memref<8x128xbf16, #tpu.memory_space<vmem>>, vector<8x128xbf16>,
      %cst_30 = arith.constant 0xFF800000 : f32
      %45 = vector.broadcast %cst_30 : f32 to vector<8x1xf32>
      %c0_31 = arith.constant 0 : index
      %c0_32 = arith.constant 0 : index
      %46 = vector.load %arg7[%c0_31, %c0_32] : memref<8x1xf32, #tpu.memory_space<vmem>>, vector<8x1xf32>
      tpu.vector_store %arg7[%c0_31, %c0_32], %45 {strides = array<i32>} : memref<8x1xf32, #tpu.memory_space<vmem>>, vector<8x1xf32>,
      %cst_33 = arith.constant 0.000000e+00 : f32
      %47 = vector.broadcast %cst_33 : f32 to vector<8x1xf32>
      %c0_34 = arith.constant 0 : index
      %c0_35 = arith.constant 0 : index
      %48 = vector.load %arg8[%c0_34, %c0_35] : memref<8x1xf32, #tpu.memory_space<vmem>>, vector<8x1xf32>
      tpu.vector_store %arg8[%c0_34, %c0_35], %47 {strides = array<i32>} : memref<8x1xf32, #tpu.memory_space<vmem>>, vector<8x1xf32>,
      %cst_36 = arith.constant 0.000000e+00 : f32
      %49 = vector.broadcast %cst_36 : f32 to vector<8x128xf32>
      %c0_37 = arith.constant 0 : index
      %c0_38 = arith.constant 0 : index
      %50 = vector.load %arg9[%c0_37, %c0_38] : memref<8x128xf32, #tpu.memory_space<vmem>>, vector<8x128xf32>
      tpu.vector_store %arg9[%c0_37, %c0_38], %49 {strides = array<i32>} : memref<8x128xf32, #tpu.memory_space<vmem>>, vector<8x128xf32>,
    } else {
    }
    %c0 = arith.constant 0 : index
    %c0_1 = arith.constant 0 : index
    %3 = vector.load %arg3[%c0, %c0_1] : memref<8x32xf32, #tpu.memory_space<vmem>>, vector<8x32xf32>
    %4 = arith.truncf %3 : vector<8x32xf32> to vector<8x32xbf16>
    %c0_2 = arith.constant 0 : index
    %c128 = arith.constant 128 : index
    %5 = vector.load %arg4[%c0_2, %c128] : memref<32x384xbf16, #tpu.memory_space<vmem>>, vector<32x256xbf16>
    %cst = arith.constant dense<0.000000e+00> : vector<8x256xf32>
    %6 = tpu.matmul %4, %5, %cst {dimension_numbers = #tpu.dot_dimension_numbers<[1], [0], [0], [1], [0, 0, 1, 1], [], []>} : vector<8x32xbf16>, vector<32x256xbf16>, vector<8x256xf32> -> vector<8x256xf32>
    %7 = vector.extract_strided_slice %6 {offsets = [0, 0], sizes = [8, 128], strides = [1, 1]} : vector<8x256xf32> to vector<8x128xf32>
    %8 = arith.truncf %7 : vector<8x128xf32> to vector<8x128xbf16>
    %9 = vector.extract_strided_slice %6 {offsets = [0, 128], sizes = [8, 128], strides = [1, 1]} : vector<8x256xf32> to vector<8x128xf32>
    %10 = arith.truncf %9 : vector<8x128xf32> to vector<8x128xbf16>
    %c0_3 = arith.constant 0 : index
    %c0_4 = arith.constant 0 : index
    %11 = vector.load %arg6[%c0_3, %c0_4] : memref<8x128xbf16, #tpu.memory_space<vmem>>, vector<8x128xbf16>
    %cst_5 = arith.constant dense<0.000000e+00> : vector<8x8xf32>
    %12 = tpu.matmul %11, %8, %cst_5 {dimension_numbers = #tpu.dot_dimension_numbers<[1], [1], [0], [0], [0, 0, 1, 0], [], []>} : vector<8x128xbf16>, vector<8x128xbf16>, vector<8x8xf32> -> vector<8x8xf32>
    %c0_6 = arith.constant 0 : index
    %c0_7 = arith.constant 0 : index
    %13 = vector.load %arg7[%c0_6, %c0_7] : memref<8x1xf32, #tpu.memory_space<vmem>>, vector<8x1xf32>
    %cst_8 = arith.constant dense<0xFF800000> : vector<8xf32>
    %14 = vector.multi_reduction <maximumf>, %12, %cst_8 [1] : vector<8x8xf32> to vector<8xf32>
    %15 = vector.shape_cast %14 : vector<8xf32> to vector<8x1xf32>
    %16 = arith.maximumf %13, %15 : vector<8x1xf32>
    %17 = arith.subf %13, %16 : vector<8x1xf32>
    %18 = math.exp %17 : vector<8x1xf32>
    %19 = vector.broadcast %16 : vector<8x1xf32> to vector<8x8xf32>
    %20 = arith.subf %12, %19 : vector<8x8xf32>
    %21 = math.exp %20 : vector<8x8xf32>
    %c0_9 = arith.constant 0 : index
    %c0_10 = arith.constant 0 : index
    %22 = vector.load %arg8[%c0_9, %c0_10] : memref<8x1xf32, #tpu.memory_space<vmem>>, vector<8x1xf32>
    %23 = arith.mulf %18, %22 : vector<8x1xf32>
    %cst_11 = arith.constant dense<0.000000e+00> : vector<8xf32>
    %24 = vector.multi_reduction <add>, %21, %cst_11 [1] : vector<8x8xf32> to vector<8xf32>
    %25 = vector.shape_cast %24 : vector<8xf32> to vector<8x1xf32>
    %26 = arith.addf %23, %25 : vector<8x1xf32>
    %c0_12 = arith.constant 0 : index
    %c0_13 = arith.constant 0 : index
    %27 = vector.load %arg8[%c0_12, %c0_13] : memref<8x1xf32, #tpu.memory_space<vmem>>, vector<8x1xf32>
    tpu.vector_store %arg8[%c0_12, %c0_13], %26 {strides = array<i32>} : memref<8x1xf32, #tpu.memory_space<vmem>>, vector<8x1xf32>,
    %c0_14 = arith.constant 0 : index
    %c0_15 = arith.constant 0 : index
    %28 = vector.load %arg9[%c0_14, %c0_15] : memref<8x128xf32, #tpu.memory_space<vmem>>, vector<8x128xf32>
    %29 = vector.broadcast %18 : vector<8x1xf32> to vector<8x128xf32>
    %30 = arith.mulf %29, %28 : vector<8x128xf32>
    %31 = arith.truncf %21 : vector<8x8xf32> to vector<8x8xbf16>
    %cst_16 = arith.constant dense<0.000000e+00> : vector<8x128xf32>
    %32 = tpu.matmul %31, %10, %cst_16 {dimension_numbers = #tpu.dot_dimension_numbers<[1], [0], [0], [1], [0, 0, 1, 1], [], []>} : vector<8x8xbf16>, vector<8x128xbf16>, vector<8x128xf32> -> vector<8x128xf32>
    %33 = arith.addf %30, %32 : vector<8x128xf32>
    %c0_17 = arith.constant 0 : index
    %c0_18 = arith.constant 0 : index
    %34 = vector.load %arg9[%c0_17, %c0_18] : memref<8x128xf32, #tpu.memory_space<vmem>>, vector<8x128xf32>
    tpu.vector_store %arg9[%c0_17, %c0_18], %33 {strides = array<i32>} : memref<8x128xf32, #tpu.memory_space<vmem>>, vector<8x128xf32>,
    %c0_19 = arith.constant 0 : index
    %c0_20 = arith.constant 0 : index
    %35 = vector.load %arg7[%c0_19, %c0_20] : memref<8x1xf32, #tpu.memory_space<vmem>>, vector<8x1xf32>
    tpu.vector_store %arg7[%c0_19, %c0_20], %16 {strides = array<i32>} : memref<8x1xf32, #tpu.memory_space<vmem>>, vector<8x1xf32>,
    %c0_i32_21 = arith.constant 0 : i32
    %36 = arith.cmpi eq, %arg1, %c0_i32_21 : i32
    %37 = arith.extui %36 : i1 to i32
    %c0_i32_22 = arith.constant 0 : i32
    %38 = arith.cmpi ne, %37, %c0_i32_22 : i32
    scf.if %38 {
      %c0_23 = arith.constant 0 : index
      %c0_24 = arith.constant 0 : index
      %39 = vector.load %arg9[%c0_23, %c0_24] : memref<8x128xf32, #tpu.memory_space<vmem>>, vector<8x128xf32>
      %c0_25 = arith.constant 0 : index
      %c0_26 = arith.constant 0 : index
      %40 = vector.load %arg8[%c0_25, %c0_26] : memref<8x1xf32, #tpu.memory_space<vmem>>, vector<8x1xf32>
      %41 = vector.broadcast %40 : vector<8x1xf32> to vector<8x128xf32>
      %42 = arith.divf %39, %41 : vector<8x128xf32>
      %c0_27 = arith.constant 0 : index
      %c0_28 = arith.constant 0 : index
      %43 = vector.load %arg5[%c0_27, %c0_28] : memref<8x128xf32, #tpu.memory_space<vmem>>, vector<8x128xf32>
      tpu.vector_store %arg5[%c0_27, %c0_28], %42 {strides = array<i32>} : memref<8x128xf32, #tpu.memory_space<vmem>>, vector<8x128xf32>,
    } else {
    }
    return
  }
  func.func @transform_0(%arg0: i32, %arg1: i32) -> (i32, i32) {
    %c0_i32 = arith.constant 0 : i32
    %c0_i32_0 = arith.constant 0 : i32
    return %arg0, %c0_i32 : i32, i32
  }
  func.func @transform_1(%arg0: i32, %arg1: i32) -> (i32, i32) {
    %c0_i32 = arith.constant 0 : i32
    %c0_i32_0 = arith.constant 0 : i32
    return %arg1, %c0_i32 : i32, i32
  }
  func.func @transform_2(%arg0: i32, %arg1: i32) -> (i32, i32) {
    %c0_i32 = arith.constant 0 : i32
    %c0_i32_0 = arith.constant 0 : i32
    %c0_i32_1 = arith.constant 0 : i32
    return %c0_i32, %c0_i32_0 : i32, i32
  }
  func.func @transform_3(%arg0: i32, %arg1: i32) -> (i32, i32) {
    %c0_i32 = arith.constant 0 : i32
    %c0_i32_0 = arith.constant 0 : i32
    return %arg0, %c0_i32 : i32, i32
  }
}

</mosaic_0001>

<bundles_post_ra>
// kernel: tpu_custom_call.1
= control target key start
LH: loop header
LB: loop body
LE: loop exit
PB: predicated region body
PF: predicated region fallthrough
CT: control target
= control target key end

     0   :  { %8 = vsyncpa [#allocation7], 0  ;;  %s481_s0 = inlined_call_operand.hbm [shape: f32[8,32], index: 0, kind: input, shape index: {}]   ;;  %s482_s1 = inlined_call_operand.hbm [shape: f32[8,32], index: 1, kind: input, shape index: {}]   ;;  %s483_s2 = inlined_call_operand.hbm [shape: bf16[32,384], index: 2, kind: input, shape index: {}]   ;;  %s484_s3 = inlined_call_operand.hbm [shape: f32[8,128], index: 3, kind: output, shape index: {}]  }
   0x1   :  { %9 = vsyncpa [#allocation10], 0  ;;  %s27_s14 = sshll.u32 %s482_s1, 4  ;;  %s28_s14 = int_to_ptr.hbm [resolvable:$true] %s27_s14 }
   0x2   :  { %10 = vsyncpa [#allocation8], 0  ;;  %s430_s15 = smov [#allocation9]   ;;  %s16_s19 = sshll.u32 %s481_s0, 4  ;;  %s17_s19 = int_to_ptr.hbm [resolvable:$true] %s16_s19 }
   0x3   :  { %s29_s16 = sshll.u32 %s430_s15, 4  ;;  %s431_s20 = smov [#allocation6]   ;;  %s30_s16 = int_to_ptr.vmem [resolvable:$true] %s29_s16 }
   0x4   :  { %32 = dma.hbm_to_vmem [thread:$0]  %s28_s14, 128, %s30_s16, [#allocation10]  }
   0x5   :  { %s18_s21 = sshll.u32 %s431_s20, 4  ;;  %s37_s24 = sshll.u32 %s483_s2, 4  ;;  %s19_s21 = int_to_ptr.vmem [resolvable:$true] %s18_s21  ;;  %s38_s24 = int_to_ptr.hbm [resolvable:$true] %s37_s24 }
   0x6   :  { %21 = dma.hbm_to_vmem [thread:$0]  %s17_s19, 128, %s19_s21, [#allocation7]  }
   0x7   :  { %s432_s1 = smov [#allocation11]   ;;  %s433_s26 = smov 192  }
   0x8   :  { %s39_s25 = sshll.u32 %s432_s1, 4  ;;  %s434_s27 = smov 12   ;;  %s40_s25 = int_to_ptr.vmem [resolvable:$true] %s39_s25 }
   0x9   :  { %45 = dma.hbm_to_vmem [thread:$0]  %s38_s24, 768, %s40_s25, [#allocation10], %s433_s26, %s433_s26, %s434_s27  }
   0xa   :  { %424 = dma.done.wait [#allocation7], 128  }
   0xb   :  { %425 = vsyncadd [#allocation7], 4294967168 }
   0xc   :  { %426 = dma.done.wait [#allocation10], 896  }
   0xd   :  { %427 = vsyncadd [#allocation10], 4294966400  ;;  %v282_v0 = vld [vmem:[#allocation11 + $0x18] sm:$0xf]  ;;  %v305_v1 = vld [vmem:[#allocation11 + $0x20] sm:$0xf0] }
   0xe   :  { %v295_v2 = vld [vmem:[#allocation11 + $0x1c] sm:$0xf]  ;;  %v283_v3 = vor.u32 %v305_v1, %v282_v0  ;;  %v309_v4 = vld [vmem:[#allocation11 + $0x24] sm:$0xf0]  ;;  %v278_v5 = vld [vmem:[#allocation11] sm:$0xf] }
   0xf   :  { %v304_v6 = vld [vmem:[#allocation11 + $0x8] sm:$0xf0]  ;;  %v296_v7 = vor.u32 %v309_v4, %v295_v2  ;;  %v287_v8 = vld [vmem:[#allocation11 + $0x4] sm:$0xf]  ;;  %v307_v9 = vld [vmem:[#allocation11 + $0xc] sm:$0xf0] }
  0x10   :  { %91 = vmatpush.bf16.msra.mxu0 %v283_v3  ;;  %v279_v10 = vor.u32 %v304_v6, %v278_v5  ;;  %v63_v11 = vld [vmem:[#allocation6] sm:$0xff]  ;;  %v288_v12 = vor.u32 %v307_v9, %v287_v8  ;;  %v104_v13 = vld [vmem:[#allocation9] sm:$0xff]  ;;  %vm81_vm0 = vcmask 261120   ;;  %v308_v23 = vld [vmem:[#allocation11 + $0x20] sm:$0xf]  ;;  %vm100_vm1 = vcmask 7168  }
  0x11   :  { %140 = vmatpush.bf16.msra.mxu1 %v296_v7  ;;  %v64_v14 = vpack.c.bf16 %v63_v11, %v63_v11  ;;  %v105_v15 = vpack.c.bf16 %v104_v13, %v104_v13  ;;  %v297_v24 = vld [vmem:[#allocation11 + $0x28] sm:$0xf0]  ;;  %v306_v25 = vld [vmem:[#allocation11 + $0x8] sm:$0xf]  ;;  %v289_v27 = vld [vmem:[#allocation11 + $0x10] sm:$0xf0] }
  0x12   :  { %v300_v26 = vor.u32 %v308_v23, %v297_v24  ;;  %v435_v28 = vmov -inf   ;;  %v292_v29 = vor.u32 %v306_v25, %v289_v27  ;;  %vm177_vm2 = vcmask 64512   ;;  %s438_s0 = smov [#allocation12]   ;;  %s265_s30 = sshll.u32 %s484_s3, 4  ;;  %s266_s30 = int_to_ptr.hbm [resolvable:$true] %s265_s30 }
  0x13   :  { %101 = vst.msk [vmem:[#allocation3] sm:$0xff] %vm100_vm1, %v435_v28  ;;  %v436_v33 = vmov 0   ;;  %v437_v34 = vmov 0.0   ;;  %vm212_vm3 = vcmask 1043456   ;;  %s263_s2 = sshll.u32 %s438_s0, 4  ;;  %s264_s2 = int_to_ptr.vmem [resolvable:$true] %s263_s2 }
  0x14   :  { %92 = vmatpush.bf16.msra.mxu0 %v279_v10  ;;  %153 = vmatpush.bf16.msra.mxu2 %v300_v26  ;;  %102 = vst.msk [vmem:[#allocation4] sm:$0xff] %vm100_vm1, %v437_v34 }
  0x15   :  { %141 = vmatpush.bf16.msra.mxu1 %v288_v12  ;;  %319 = vset.pattern.permute.xlu0 %v436_v33 }
  0x16   :  { %321 = vset.pattern.permute.xlu2 %v436_v33  ;;  %320 = vset.pattern.permute.xlu1 %v436_v33 }
  0x17   :  { %284 = vmatmul.msk.bf16.vlgmr.msra.gmra.mxu0 %vm81_vm0, %v64_v14 }
  0x18   :  { %301 = vmatmul.msk.bf16.vlgmr.msra.gmra.mxu1 %vm81_vm0, %v105_v15  ;;  %154 = vmatpush.bf16.msra.mxu2 %v292_v29 }
  0x1a   :  { %v176_v35 = vld [vmem:[#allocation3] sm:$0xff] }
  0x1b   :  { %302 = vmatmul.msk.bf16.vlgmr.msra.gmra.mxu2 %vm81_vm0, %v105_v15  ;;  %v193_v51 = vld [vmem:[#allocation4] sm:$0xff] }
  0x94   :  { %v94_v16 = vpop.f32.mrf.mxu0 }
  0x95   :  { %v98_v17 = vpack.c.bf16 %v94_v16, %v94_v16  ;;  %v143_v18 = vpop.f32.mrf.mxu1 }
  0x96   :  { %v160_v19 = vpack.c.bf16 %v143_v18, %v143_v18 }
  0x97   :  { %99 = vst [vmem:[#allocation2] sm:$0xf] %v98_v17 }
  0x98   :  { %170 = vmatpush.bf16.xpose.msra.mxu3 %v160_v19 }
  0x9c   :  { %v96_v20 = vpop.f32.mrf.mxu0 }
  0x9d   :  { %v145_v21 = vpop.f32.mrf.mxu1 }
  0x9e   :  { %v162_v22 = vld [vmem:[#allocation2] sm:$0xf]  ;;  %v156_v41 = vpop.f32.mrf.mxu2 }
  0x9f   :  { %171 = vmatmul.bf16.vlgmr.msra.gmra.mxu3 %v162_v22  ;;  %v161_v42 = vpack.c.bf16 %v156_v41, %v156_v41 }
  0xa1   :  { %v214_v43 = vsel %vm212_vm3, %v161_v42, 0 }
  0xa2   :  { %223 = vmatpush.bf16.msrb.mxu0 %v214_v43 }
  0xa6   :  { %v158_v44 = vpop.f32.mrf.mxu2 }
 0x122   :  { %v172_v30 = vpop.f32.mrf.mxu3 }
 0x123   :  { %v178_v31 = vsel %vm177_vm2, %v172_v30, -inf }
 0x124   :  { %179 = vmax.xlane.f32.xlu0 %v178_v31 }
 0x12a   :  { %v174_v32 = vpop.f32.mrf.mxu3 }
 0x197   :  { %v180_v36 = vpop.xlane.xlu0 %179 }
 0x198   :  { %v181_v37 = vmax.f32 %v176_v35, %v180_v36 }
 0x19a   :  { %v182_v38 = vsub.f32 %v176_v35, %v181_v37  ;;  %231 = vst.msk [vmem:[#allocation3] sm:$0xff] %vm100_vm1, %v181_v37  ;;  %187 = vperm.xlu0 %319, %v181_v37  }
 0x19c   :  { %v183_v39 = vmul.f32 1.442695, %v182_v38 }
 0x19e   :  { %322 = vpow2.f32 %v183_v39 }
 0x1a4   :  { %v323_v40 = vpop.eup %322 }
 0x1a5   :  { %204 = vperm.xlu2 %321, %v323_v40   ;;  %v194_v52 = vmul.f32 %v323_v40, %v193_v51 }
 0x1ff   :  { %v205_v62 = vpop.permute.xlu2 %204 }
 0x200   :  { %v207_v2 = vmul.f32 0.0, %v205_v62 }
 0x20c   :  { %v188_v45 = vpop.permute.xlu0 %187 }
 0x20d   :  { %v190_v46 = vsub.f32 %v172_v30, %v188_v45 }
 0x20f   :  { %v191_v47 = vmul.f32 1.442695, %v190_v46 }
 0x211   :  { %324 = vpow2.f32 %v191_v47 }
 0x217   :  { %v325_v48 = vpop.eup %324 }
 0x218   :  { %v195_v49 = vsel %vm177_vm2, %v325_v48, 0.0  ;;  %v208_v50 = vpack.c.bf16 %v325_v48, %v325_v48 }
 0x219   :  { %196 = vadd.xlane.f32.xlu1 %v195_v49 }
 0x21a   :  { %303 = vmatmul.msk.bf16.vlgmr.msrb.gmra.mxu0 %vm177_vm2, %v208_v50 }
 0x28c   :  { %v197_v53 = vpop.xlane.xlu1 %196 }
 0x28d   :  { %v198_v54 = vadd.f32 %v197_v53, %v194_v52 }
 0x28f   :  { %200 = vst.msk [vmem:[#allocation4] sm:$0xff] %vm100_vm1, %v198_v54 }
 0x296   :  { %v236_v55 = vld [vmem:[#allocation4] sm:$0xff] }
 0x297   :  { %239 = vperm.xlu1 %320, %v236_v55   ;;  %v225_v56 = vpop.f32.mrf.mxu0 }
 0x298   :  { %v229_v5 = vadd.f32 %v225_v56, %v207_v2 }
 0x29f   :  { %v227_v57 = vpop.f32.mrf.mxu0 }
 0x309   :  { %v240_v58 = vpop.permute.xlu1 %239 }
 0x30a   :  { %326 = vrcp.f32 %v240_v58  ;;  %v253_v63 = vand.u32 2147483648, %v240_v58  ;;  %v251_v1 = vand.u32 2147483647, %v240_v58  ;;  %vm247_vm5 = vweird.f32 %v240_v58 }
 0x30c   :  { %v254_v4 = vor.u32 1.1754944e-38, %v253_v63  ;;  %vm252_vm7 = vcmp.eq.f32.partialorder %v251_v1, 8.507059e+37 }
 0x310   :  { %v327_v59 = vpop.eup %326 }
 0x311   :  { %v243_v60 = vmul.f32 %v327_v59, %v240_v58  ;;  %vm248_vm4 = vweird.f32 %v327_v59 }
 0x312   :  { %vm249_vm6 = vmor %vm247_vm5, %vm248_vm4 }
 0x313   :  { %v244_v61 = vsub.f32 1.0, %v243_v60 }
 0x315   :  { %v245_v0 = vmul.f32 %v327_v59, %v244_v61 }
 0x317   :  { %v246_v3 = vadd.f32 %v327_v59, %v245_v0 }
 0x319   :  { %v250_v6 = vsel %vm249_vm6, %v327_v59, %v246_v3 }
 0x31a   :  { %v255_v7 = vsel %vm252_vm7, %v254_v4, %v250_v6 }
 0x31b   :  { %v256_v8 = vmul.f32 %v255_v7, %v229_v5 }
 0x31d   :  { %257 = vst [vmem:[#allocation12] sm:$0xff] %v256_v8 }
 0x31e   :  { %268 = dma.vmem_to_hbm [thread:$0]  %s264_s2, 128, %s266_s30, [#allocation8]  }
 0x31f   :  { %428 = dma.done.wait [#allocation8], 128  }
 0x320   :  { %429 = vsyncadd [#allocation8], 4294967168 }
 0x321   :  { %273 = vsyncpa [#allocation7], 1 }
 0x322   :  { %274 = vsyncpa [#allocation10], 1 }
 0x323   :  { %275 = vsyncpa [#allocation8], 1 }

</bundles_post_ra>
